<compile_context>
chip_gen: v5e
topology: v5e:2x2
jax: 0.10.0
libtpu: 0.0.40
codegen_flags: <defaults>
</compile_context>

<pallas_src>
import functools  # noqa: F401  (kept for easy kwargs-partial variants)

import jax
import jax.numpy as jnp
from jax.experimental import pallas as pl
from jax.experimental.pallas import tpu as pltpu

IN_FEATURES = 8


def _leaky_relu(x, slope=0.1):
    return jnp.where(x > 0, x, slope * x)


def _round_up(x, m):
    return (x + m - 1) // m * m


def moveable_encoder_kernel(x_ref, w_in_ref, b_in_ref, w2_ref, b2_ref, w3_ref,
                            o_ref):
    h_pad = o_ref.shape[-1]                         # padded hidden size (mult of 128)
    mxu_dtype = w_in_ref.dtype

    x = x_ref[...].astype(mxu_dtype)                # (TN, 8)

    # Fused first layer: [w1 | w_skip] in one K=8 matmul, bias = [b1 | bs+b3].
    hs = jnp.dot(x, w_in_ref[...],
                 preferred_element_type=jnp.float32) + b_in_ref[...]   # (TN, 2*H_pad)
    h = hs[:, :h_pad]                               # mlp1 first Linear output (f32)
    skip = hs[:, h_pad:]                            # x @ ws + (bs + b3)     (f32)

    # mlp1: LeakyReLU(0.1) -> Linear(H, H)
    h = _leaky_relu(h)
    h = jnp.dot(h.astype(mxu_dtype), w2_ref[...],
                preferred_element_type=jnp.float32) + b2_ref[...]

    # outer leaky_relu around mlp1 output
    net = _leaky_relu(h)

    # mlp2(net) (bias already folded into `skip`), residual add, final leaky_relu
    m2 = jnp.dot(net.astype(mxu_dtype), w3_ref[...],
                 preferred_element_type=jnp.float32)
    o_ref[...] = _leaky_relu(skip + m2).astype(o_ref.dtype)


def _pack_params(params, mxu_dtype):
    """Pad hidden dim to a multiple of 128, fuse w1|ws and fold b3 into the skip bias."""
    H = params["w1"].shape[1]
    H_pad = max(_round_up(H, 128), 128)
    p = H_pad - H

    w1 = jnp.pad(params["w1"], ((0, 0), (0, p)))
    ws = jnp.pad(params["ws"], ((0, 0), (0, p)))
    w2 = jnp.pad(params["w2"], ((0, p), (0, p)))
    w3 = jnp.pad(params["w3"], ((0, p), (0, p)))
    b1 = jnp.pad(params["b1"], ((0, 0), (0, p)))
    b2 = jnp.pad(params["b2"], ((0, 0), (0, p)))
    b_skip = jnp.pad(params["bs"] + params["b3"], ((0, 0), (0, p)))   # fold b3 into bs

    w_in = jnp.concatenate([w1, ws], axis=1).astype(mxu_dtype)        # (8, 2*H_pad)
    b_in = jnp.concatenate([b1, b_skip], axis=1).astype(jnp.float32)  # (1, 2*H_pad)

    return dict(
        w_in=w_in, b_in=b_in,
        w2=w2.astype(mxu_dtype), b2=b2.astype(jnp.float32),
        w3=w3.astype(mxu_dtype),
        H=H, H_pad=H_pad,
    )


def moveable_encoder(box_input, params, *, tile_n=512, mxu_dtype=jnp.bfloat16):
    """box_input: (N, 8) float32; params: dict of (in,out) weights and (1,H) biases."""
    N, F = box_input.shape
    assert F == IN_FEATURES

    packed = _pack_params(params, mxu_dtype)
    H, H_pad = packed["H"], packed["H_pad"]

    # Choose a large row tile (multiple of 8); pad N instead of asserting divisibility.
    tile_n = _round_up(min(tile_n, _round_up(N, 8)), 8)
    N_pad = _round_up(N, tile_n)

    x = box_input.astype(mxu_dtype)
    if N_pad != N:
        x = jnp.pad(x, ((0, N_pad - N), (0, 0)))

    x_spec = pl.BlockSpec((tile_n, IN_FEATURES), lambda i: (i, 0))
    o_spec = pl.BlockSpec((tile_n, H_pad), lambda i: (i, 0))

    def full_spec(arr):
        nd = arr.ndim
        return pl.BlockSpec(arr.shape, lambda i, _nd=nd: (0,) * _nd)

    out = pl.pallas_call(
        moveable_encoder_kernel,
        out_shape=jax.ShapeDtypeStruct((N_pad, H_pad), jnp.float32),
        grid=(N_pad // tile_n,),
        in_specs=[
            x_spec,
            full_spec(packed["w_in"]), full_spec(packed["b_in"]),
            full_spec(packed["w2"]), full_spec(packed["b2"]),
            full_spec(packed["w3"]),
        ],
        out_specs=o_spec,
        compiler_params=pltpu.CompilerParams(
            dimension_semantics=("parallel",)),
    )(x, packed["w_in"], packed["b_in"], packed["w2"], packed["b2"],
      packed["w3"])

    return out[:N, :H]


def init_params(key, hidden_size):
    """Deterministic synthetic parameters (PyTorch (out,in) weights transposed to (in,out))."""
    ks = jax.random.split(key, 8)
    H = hidden_size

    def lin(kw, kb, fan_in, fan_out):
        bound = 1.0 / jnp.sqrt(fan_in)
        w = jax.random.uniform(kw, (fan_in, fan_out), jnp.float32, -bound, bound)
        b = jax.random.uniform(kb, (1, fan_out), jnp.float32, -bound, bound)
        return w, b

    w1, b1 = lin(ks[0], ks[1], IN_FEATURES, H)   # mlp1[0]: Linear(8, H)
    w2, b2 = lin(ks[2], ks[3], H, H)             # mlp1[2]: Linear(H, H)
    w3, b3 = lin(ks[4], ks[5], H, H)             # mlp2:    Linear(H, H)
    ws, bs = lin(ks[6], ks[7], IN_FEATURES, H)   # mlp_skip: Linear(8, H)
    return dict(w1=w1, b1=b1, w2=w2, b2=b2, w3=w3, b3=b3, ws=ws, bs=bs)


def reference(x, p):
    """Pure-JAX f32 reference of the PyTorch forward."""
    h = _leaky_relu(x @ p["w1"] + p["b1"])
    h = h @ p["w2"] + p["b2"]
    net = _leaky_relu(h)
    out = _leaky_relu((x @ p["ws"] + p["bs"]) + (net @ p["w3"] + p["b3"]))
    return out


if __name__ == "__main__":
    key = jax.random.PRNGKey(0)
    k_x, k_p = jax.random.split(key)

    N, HIDDEN = 16, 32
    box_input = jax.random.normal(k_x, (N, IN_FEATURES), jnp.float32)
    params = init_params(k_p, HIDDEN)

    out = moveable_encoder(box_input, params)        # bf16 MXU path (default)
    out = jax.block_until_ready(out)

    ref = reference(box_input, params)
    assert out.shape == (N, HIDDEN)
    # bf16 matmul operands with f32 accumulation -> loosened tolerance.
    assert jnp.allclose(out, ref, atol=5e-2, rtol=5e-2), "mismatch vs reference"
    print("KERNEL_OK")
</pallas_src>

<mosaic_0001>
module attributes {stable_mosaic.version = 11 : i64} {
  func.func @moveable_encoder_kernel(%arg0: i32, %arg1: memref<16x8xbf16, #tpu.memory_space<vmem>>, %arg2: memref<8x256xbf16, #tpu.memory_space<vmem>>, %arg3: memref<1x256xf32, #tpu.memory_space<vmem>>, %arg4: memref<128x128xbf16, #tpu.memory_space<vmem>>, %arg5: memref<1x128xf32, #tpu.memory_space<vmem>>, %arg6: memref<128x128xbf16, #tpu.memory_space<vmem>>, %arg7: memref<16x128xf32, #tpu.memory_space<vmem>>) attributes {dimension_semantics = [#tpu.dimension_semantics<parallel>], iteration_bounds = array<i64: 1>, scalar_prefetch = 0 : i64, scratch_operands = 0 : i64, tpu.core_type = #tpu.core_type<tc>, window_params = [{transform_indices = @transform_0, window_bounds = array<i64: 16, 8>}, {pipeline_mode = #tpu.pipeline_mode<synchronous>, transform_indices = @transform_1, window_bounds = array<i64: 8, 256>}, {pipeline_mode = #tpu.pipeline_mode<synchronous>, transform_indices = @transform_2, window_bounds = array<i64: 1, 256>}, {pipeline_mode = #tpu.pipeline_mode<synchronous>, transform_indices = @transform_3, window_bounds = array<i64: 128, 128>}, {pipeline_mode = #tpu.pipeline_mode<synchronous>, transform_indices = @transform_4, window_bounds = array<i64: 1, 128>}, {pipeline_mode = #tpu.pipeline_mode<synchronous>, transform_indices = @transform_5, window_bounds = array<i64: 128, 128>}, {transform_indices = @transform_6, window_bounds = array<i64: 16, 128>}]} {
    %c0 = arith.constant 0 : index
    %c0_0 = arith.constant 0 : index
    %0 = vector.load %arg1[%c0, %c0_0] : memref<16x8xbf16, #tpu.memory_space<vmem>>, vector<16x8xbf16>
    %c0_1 = arith.constant 0 : index
    %c0_2 = arith.constant 0 : index
    %1 = vector.load %arg2[%c0_1, %c0_2] : memref<8x256xbf16, #tpu.memory_space<vmem>>, vector<8x256xbf16>
    %cst = arith.constant dense<0.000000e+00> : vector<16x256xf32>
    %2 = tpu.matmul %0, %1, %cst {dimension_numbers = #tpu.dot_dimension_numbers<[1], [0], [0], [1], [0, 0, 1, 1], [], []>} : vector<16x8xbf16>, vector<8x256xbf16>, vector<16x256xf32> -> vector<16x256xf32>
    %c0_3 = arith.constant 0 : index
    %c0_4 = arith.constant 0 : index
    %3 = vector.load %arg3[%c0_3, %c0_4] : memref<1x256xf32, #tpu.memory_space<vmem>>, vector<1x256xf32>
    %4 = vector.broadcast %3 : vector<1x256xf32> to vector<16x256xf32>
    %5 = arith.addf %2, %4 : vector<16x256xf32>
    %6 = vector.extract_strided_slice %5 {offsets = [0, 0], sizes = [16, 128], strides = [1, 1]} : vector<16x256xf32> to vector<16x128xf32>
    %7 = vector.extract_strided_slice %5 {offsets = [0, 128], sizes = [16, 128], strides = [1, 1]} : vector<16x256xf32> to vector<16x128xf32>
    %cst_5 = arith.constant 0.000000e+00 : f32
    %8 = vector.broadcast %cst_5 : f32 to vector<16x128xf32>
    %9 = arith.cmpf ogt, %6, %8 : vector<16x128xf32>
    %cst_6 = arith.constant 1.000000e-01 : f32
    %10 = vector.broadcast %cst_6 : f32 to vector<16x128xf32>
    %11 = arith.mulf %10, %6 : vector<16x128xf32>
    %12 = arith.select %9, %6, %11 : vector<16x128xi1>, vector<16x128xf32>
    %13 = arith.truncf %12 : vector<16x128xf32> to vector<16x128xbf16>
    %c0_7 = arith.constant 0 : index
    %c0_8 = arith.constant 0 : index
    %14 = vector.load %arg4[%c0_7, %c0_8] : memref<128x128xbf16, #tpu.memory_space<vmem>>, vector<128x128xbf16>
    %cst_9 = arith.constant dense<0.000000e+00> : vector<16x128xf32>
    %15 = tpu.matmul %13, %14, %cst_9 {dimension_numbers = #tpu.dot_dimension_numbers<[1], [0], [0], [1], [0, 0, 1, 1], [], []>} : vector<16x128xbf16>, vector<128x128xbf16>, vector<16x128xf32> -> vector<16x128xf32>
    %c0_10 = arith.constant 0 : index
    %c0_11 = arith.constant 0 : index
    %16 = vector.load %arg5[%c0_10, %c0_11] : memref<1x128xf32, #tpu.memory_space<vmem>>, vector<1x128xf32>
    %17 = vector.broadcast %16 : vector<1x128xf32> to vector<16x128xf32>
    %18 = arith.addf %15, %17 : vector<16x128xf32>
    %cst_12 = arith.constant 0.000000e+00 : f32
    %19 = vector.broadcast %cst_12 : f32 to vector<16x128xf32>
    %20 = arith.cmpf ogt, %18, %19 : vector<16x128xf32>
    %cst_13 = arith.constant 1.000000e-01 : f32
    %21 = vector.broadcast %cst_13 : f32 to vector<16x128xf32>
    %22 = arith.mulf %21, %18 : vector<16x128xf32>
    %23 = arith.select %20, %18, %22 : vector<16x128xi1>, vector<16x128xf32>
    %24 = arith.truncf %23 : vector<16x128xf32> to vector<16x128xbf16>
    %c0_14 = arith.constant 0 : index
    %c0_15 = arith.constant 0 : index
    %25 = vector.load %arg6[%c0_14, %c0_15] : memref<128x128xbf16, #tpu.memory_space<vmem>>, vector<128x128xbf16>
    %cst_16 = arith.constant dense<0.000000e+00> : vector<16x128xf32>
    %26 = tpu.matmul %24, %25, %cst_16 {dimension_numbers = #tpu.dot_dimension_numbers<[1], [0], [0], [1], [0, 0, 1, 1], [], []>} : vector<16x128xbf16>, vector<128x128xbf16>, vector<16x128xf32> -> vector<16x128xf32>
    %27 = arith.addf %7, %26 : vector<16x128xf32>
    %cst_17 = arith.constant 0.000000e+00 : f32
    %28 = vector.broadcast %cst_17 : f32 to vector<16x128xf32>
    %29 = arith.cmpf ogt, %27, %28 : vector<16x128xf32>
    %cst_18 = arith.constant 1.000000e-01 : f32
    %30 = vector.broadcast %cst_18 : f32 to vector<16x128xf32>
    %31 = arith.mulf %30, %27 : vector<16x128xf32>
    %32 = arith.select %29, %27, %31 : vector<16x128xi1>, vector<16x128xf32>
    %c0_19 = arith.constant 0 : index
    %c0_20 = arith.constant 0 : index
    %33 = vector.load %arg7[%c0_19, %c0_20] : memref<16x128xf32, #tpu.memory_space<vmem>>, vector<16x128xf32>
    tpu.vector_store %arg7[%c0_19, %c0_20], %32 {strides = array<i32>} : memref<16x128xf32, #tpu.memory_space<vmem>>, vector<16x128xf32>,
    return
  }
  func.func @transform_0(%arg0: i32) -> (i32, i32) {
    %c0_i32 = arith.constant 0 : i32
    %c0_i32_0 = arith.constant 0 : i32
    return %arg0, %c0_i32 : i32, i32
  }
  func.func @transform_1(%arg0: i32) -> (i32, i32) {
    %c0_i32 = arith.constant 0 : i32
    %c0_i32_0 = arith.constant 0 : i32
    %c0_i32_1 = arith.constant 0 : i32
    return %c0_i32, %c0_i32_0 : i32, i32
  }
  func.func @transform_2(%arg0: i32) -> (i32, i32) {
    %c0_i32 = arith.constant 0 : i32
    %c0_i32_0 = arith.constant 0 : i32
    %c0_i32_1 = arith.constant 0 : i32
    return %c0_i32, %c0_i32_0 : i32, i32
  }
  func.func @transform_3(%arg0: i32) -> (i32, i32) {
    %c0_i32 = arith.constant 0 : i32
    %c0_i32_0 = arith.constant 0 : i32
    %c0_i32_1 = arith.constant 0 : i32
    return %c0_i32, %c0_i32_0 : i32, i32
  }
  func.func @transform_4(%arg0: i32) -> (i32, i32) {
    %c0_i32 = arith.constant 0 : i32
    %c0_i32_0 = arith.constant 0 : i32
    %c0_i32_1 = arith.constant 0 : i32
    return %c0_i32, %c0_i32_0 : i32, i32
  }
  func.func @transform_5(%arg0: i32) -> (i32, i32) {
    %c0_i32 = arith.constant 0 : i32
    %c0_i32_0 = arith.constant 0 : i32
    %c0_i32_1 = arith.constant 0 : i32
    return %c0_i32, %c0_i32_0 : i32, i32
  }
  func.func @transform_6(%arg0: i32) -> (i32, i32) {
    %c0_i32 = arith.constant 0 : i32
    %c0_i32_0 = arith.constant 0 : i32
    return %arg0, %c0_i32 : i32, i32
  }
}

</mosaic_0001>

<bundles_post_ra>
// kernel: tpu_custom_call.1
= control target key start
LH: loop header
LB: loop body
LE: loop exit
PB: predicated region body
PF: predicated region fallthrough
CT: control target
= control target key end

     0   :  { %11 = vsyncpa [#allocation3], 0  ;;  %s559_s0 = inlined_call_operand.vmem [shape: bf16[16,8], index: 0, kind: input, shape index: {}]   ;;  %s560_s1 = inlined_call_operand.vmem [shape: bf16[8,256], index: 1, kind: input, shape index: {}]   ;;  %s561_s2 = inlined_call_operand.vmem [shape: f32[1,256], index: 2, kind: input, shape index: {}]   ;;  %s562_s3 = inlined_call_operand.hbm [shape: bf16[128,128], index: 3, kind: input, shape index: {}]   ;;  %s563_s4 = inlined_call_operand.vmem [shape: f32[1,128], index: 4, kind: input, shape index: {}]   ;;  %s564_s5 = inlined_call_operand.hbm [shape: bf16[128,128], index: 5, kind: input, shape index: {}]   ;;  %s565_s6 = inlined_call_operand.hbm [shape: f32[16,128], index: 6, kind: output, shape index: {}]  }
   0x1   :  { %12 = vsyncpa [#allocation6], 0 }
   0x2   :  { %13 = vsyncpa [#allocation4], 0  ;;  %s24_s23 = sshll.u32 %s562_s3, 4  ;;  %s492_s24 = smov [#allocation2]   ;;  %s25_s23 = int_to_ptr.hbm [resolvable:$true] %s24_s23 }
   0x3   :  { %s26_s25 = sshll.u32 %s492_s24, 4  ;;  %s39_s28 = sshll.u32 %s564_s5, 4  ;;  %s27_s25 = int_to_ptr.vmem [resolvable:$true] %s26_s25  ;;  %s40_s28 = int_to_ptr.hbm [resolvable:$true] %s39_s28 }
   0x4   :  { %s493_s29 = smov 64   ;;  %s494_s30 = smov 4  }
   0x5   :  { %32 = dma.hbm_to_vmem [thread:$0]  %s25_s23, 1024, %s27_s25, [#allocation3], %s493_s29, %s493_s29, %s494_s30  }
   0x6   :  { %s495_s7 = smov [#allocation5]  }
   0x7   :  { %s41_s8 = sshll.u32 %s495_s7, 4  ;;  %s42_s8 = int_to_ptr.vmem [resolvable:$true] %s41_s8 }
   0x8   :  { %47 = dma.hbm_to_vmem [thread:$0]  %s40_s28, 1024, %s42_s8, [#allocation6], %s493_s29, %s493_s29, %s494_s30  }
   0x9   :  { %486 = dma.done.wait [#allocation3], 1024  }
   0xa   :  { %487 = vsyncadd [#allocation3], 4294966272 }
   0xb   :  { %488 = dma.done.wait [#allocation6], 1024  }
   0xc   :  { %489 = vsyncadd [#allocation6], 4294966272  ;;  %v59_v0 = vld [vmem:[%s560_s1] sm:$0xff]  ;;  %v397_v1 = vld [vmem:[#allocation2 + $0x38] sm:$0xff]  ;;  %vm80_vm0 = vcmask 1043456   ;;  %vm76_vm1 = vcmask 64512  }
   0xd   :  { %v72_v2 = vunpack.c.l.b16 %v59_v0  ;;  %190 = vmatpush.bf16.msra.mxu2 %v397_v1  ;;  %v396_v3 = vld [vmem:[#allocation2 + $0x30] sm:$0xff]  ;;  %v389_v6 = vld [vmem:[%s559_s0] sm:$0xff]  ;;  %v395_v7 = vld [vmem:[#allocation2 + $0x28] sm:$0xff]  ;;  %v73_v30 = vunpack.c.h.b16 %v59_v0  ;;  %s305_s15 = sshll.u32 %s565_s6, 4  ;;  %s497_s16 = smov 128   ;;  %s306_s15 = int_to_ptr.hbm [resolvable:$true] %s305_s15 }
   0xe   :  { %v394_v8 = vld [vmem:[#allocation2 + $0x20] sm:$0xff]  ;;  %v393_v9 = vld [vmem:[#allocation2 + $0x18] sm:$0xff]  ;;  %v392_v10 = vld [vmem:[#allocation2 + $0x10] sm:$0xff]  ;;  %s498_s17 = smov 8  }
   0xf   :  { %v74_v4 = vpack.c.b16 %v72_v2, %v72_v2  ;;  %v391_v11 = vld [vmem:[#allocation2 + $0x8] sm:$0xff]  ;;  %v390_v12 = vld [vmem:[#allocation2] sm:$0xff]  ;;  %v405_v13 = vld [vmem:[#allocation5 + $0x38] sm:$0xff]  ;;  %v75_v31 = vpack.c.b16 %v73_v30, %v73_v30 }
  0x10   :  { %275 = vmatpush.bf16.msra.mxu3 %v405_v13  ;;  %v404_v14 = vld [vmem:[#allocation5 + $0x30] sm:$0xff]  ;;  %v403_v15 = vld [vmem:[#allocation5 + $0x28] sm:$0xff]  ;;  %v402_v16 = vld [vmem:[#allocation5 + $0x20] sm:$0xff] }
  0x11   :  { %v82_v5 = vsel %vm80_vm0, %v74_v4, 0  ;;  %191 = vmatpush.bf16.msra.mxu2 %v396_v3  ;;  %v60_v17 = vld [vmem:[%s561_s2] sm:$0x3]  ;;  %v401_v28 = vld [vmem:[#allocation5 + $0x18] sm:$0xff]  ;;  %v400_v29 = vld [vmem:[#allocation5 + $0x10] sm:$0xff]  ;;  %v85_v33 = vsel %vm80_vm0, %v75_v31, 0 }
  0x12   :  { %94 = vmatpush.bf16.msra.mxu0 %v82_v5  ;;  %v62_v19 = vperm.slane %v60_v17, 0  ;;  %v399_v32 = vld [vmem:[#allocation5 + $0x8] sm:$0xff]  ;;  %108 = vmatpush.bf16.msra.mxu1 %v85_v33  ;;  %v398_v34 = vld [vmem:[#allocation5] sm:$0xff]  ;;  %v63_v45 = vperm.slane %v60_v17, 1 }
  0x13   :  { %v413_v36 = vld [vmem:[%s563_s4] ss:$0 sm:$0xff]  ;;  %s496_s4 = smov [#allocation7]  }
  0x14   :  { %276 = vmatpush.bf16.msra.mxu3 %v404_v14  ;;  %s303_s12 = sshll.u32 %s496_s4, 4  ;;  %s304_s12 = int_to_ptr.vmem [resolvable:$true] %s303_s12 }
  0x15   :  { %323 = vmatmul.msk.bf16.vlgmr.msra.gmra.mxu0 %vm76_vm1, %v389_v6  ;;  %192 = vmatpush.bf16.msra.mxu2 %v395_v7 }
  0x16   :  { %324 = vmatmul.msk.bf16.vlgmr.msra.gmra.mxu1 %vm76_vm1, %v389_v6 }
  0x18   :  { %277 = vmatpush.bf16.msra.mxu3 %v403_v15 }
  0x19   :  { %193 = vmatpush.bf16.msra.mxu2 %v394_v8 }
  0x1c   :  { %278 = vmatpush.bf16.msra.mxu3 %v402_v16 }
  0x1d   :  { %194 = vmatpush.bf16.msra.mxu2 %v393_v9 }
  0x20   :  { %279 = vmatpush.bf16.msra.mxu3 %v401_v28 }
  0x21   :  { %195 = vmatpush.bf16.msra.mxu2 %v392_v10 }
  0x24   :  { %280 = vmatpush.bf16.msra.mxu3 %v400_v29 }
  0x25   :  { %196 = vmatpush.bf16.msra.mxu2 %v391_v11 }
  0x28   :  { %281 = vmatpush.bf16.msra.mxu3 %v399_v32 }
  0x29   :  { %197 = vmatpush.bf16.msra.mxu2 %v390_v12 }
  0x2c   :  { %282 = vmatpush.bf16.msra.mxu3 %v398_v34 }
  0x92   :  { %v96_v18 = vpop.f32.mrf.mxu0 }
  0x93   :  { %v97_v20 = vadd.f32 %v96_v18, %v62_v19  ;;  %v110_v46 = vpop.f32.mrf.mxu1 }
  0x94   :  { %v111_v47 = vadd.f32 %v110_v46, %v63_v45 }
  0x95   :  { %v117_v22 = vmul.f32 0.1, %v97_v20  ;;  %vm115_vm2 = vcmp.gt.f32.partialorder %v97_v20, 0.0 }
  0x97   :  { %v119_v25 = vsel %vm115_vm2, %v97_v20, %v117_v22 }
  0x9a   :  { %v98_v21 = vpop.f32.mrf.mxu0 }
  0x9b   :  { %v99_v23 = vadd.f32 %v98_v21, %v62_v19  ;;  %v112_v51 = vpop.f32.mrf.mxu1 }
  0x9c   :  { %v113_v53 = vadd.f32 %v112_v51, %v63_v45 }
  0x9d   :  { %v118_v24 = vmul.f32 0.1, %v99_v23  ;;  %vm116_vm3 = vcmp.gt.f32.partialorder %v99_v23, 0.0 }
  0x9f   :  { %v120_v26 = vsel %vm116_vm3, %v99_v23, %v118_v24 }
  0xa0   :  { %v121_v27 = vpack.c.bf16 %v120_v26, %v119_v25 }
  0xa2   :  { %198 = vmatmul.bf16.vlgmr.msra.gmra.mxu2 %v121_v27 }
 0x125   :  { %v199_v35 = vpop.f32.mrf.mxu2 }
 0x126   :  { %v200_v37 = vadd.f32 %v413_v36, %v199_v35 }
 0x128   :  { %v206_v39 = vmul.f32 0.1, %v200_v37  ;;  %vm204_vm4 = vcmp.gt.f32.partialorder %v200_v37, 0.0 }
 0x12a   :  { %v208_v42 = vsel %vm204_vm4, %v200_v37, %v206_v39 }
 0x12d   :  { %v201_v38 = vpop.f32.mrf.mxu2 }
 0x12e   :  { %v202_v40 = vadd.f32 %v413_v36, %v201_v38 }
 0x130   :  { %v207_v41 = vmul.f32 0.1, %v202_v40  ;;  %vm205_vm5 = vcmp.gt.f32.partialorder %v202_v40, 0.0 }
 0x132   :  { %v209_v43 = vsel %vm205_vm5, %v202_v40, %v207_v41 }
 0x133   :  { %v210_v44 = vpack.c.bf16 %v209_v43, %v208_v42 }
 0x135   :  { %283 = vmatmul.bf16.vlgmr.msra.gmra.mxu3 %v210_v44 }
 0x1b8   :  { %v284_v48 = vpop.f32.mrf.mxu3 }
 0x1b9   :  { %v289_v49 = vadd.f32 %v284_v48, %v111_v47 }
 0x1bb   :  { %vm291_vm6 = vcmp.gt.f32.partialorder %v289_v49, 0.0  ;;  %v293_v50 = vmul.f32 0.1, %v289_v49 }
 0x1bd   :  { %v295_v52 = vsel %vm291_vm6, %v289_v49, %v293_v50 }
 0x1be   :  { %297 = vst [vmem:[#allocation7] sm:$0xff] %v295_v52 }
 0x1c0   :  { %v286_v54 = vpop.f32.mrf.mxu3 }
 0x1c1   :  { %v290_v55 = vadd.f32 %v286_v54, %v113_v53 }
 0x1c3   :  { %vm292_vm7 = vcmp.gt.f32.partialorder %v290_v55, 0.0  ;;  %v294_v56 = vmul.f32 0.1, %v290_v55 }
 0x1c5   :  { %v296_v57 = vsel %vm292_vm7, %v290_v55, %v294_v56 }
 0x1c6   :  { %298 = vst [vmem:[#allocation7 + $0x8] sm:$0xff] %v296_v57 }
 0x1c7   :  { %311 = dma.vmem_to_hbm [thread:$0]  %s304_s12, 256, %s306_s15, [#allocation4], %s497_s16, %s497_s16, %s498_s17  }
 0x1c8   :  { %490 = dma.done.wait [#allocation4], 256  }
 0x1c9   :  { %491 = vsyncadd [#allocation4], 4294967040 }
 0x1ca   :  { %316 = vsyncpa [#allocation3], 1 }
 0x1cb   :  { %317 = vsyncpa [#allocation6], 1 }
 0x1cc   :  { %318 = vsyncpa [#allocation4], 1 }

</bundles_post_ra>
